<compile_context>
chip_gen: v6e
topology: v6e:2x2x1
jax: 0.10.0
libtpu: 0.0.40
codegen_flags: <defaults>
</compile_context>

<pallas_src>
import functools

import jax
import jax.numpy as jnp
from jax import lax
from jax.experimental import pallas as pl
from jax.experimental.pallas import tpu as pltpu


def _round_up(x, m):
    return ((x + m - 1) // m) * m


def _vmem_limit(*block_bytes):
    # Double-buffered blocks + slack, clamped to a portable range
    # (>= default scoped VMEM everywhere, well under physical capacity).
    est = 2 * int(sum(block_bytes)) + (4 << 20)
    return int(min(max(est, 32 << 20), 96 << 20))


# ----------------------------------------------------------------------------
# Ensemble-mean path: one fused MLP over member-concatenated weights.
# ----------------------------------------------------------------------------
def _fused_ensemble_kernel(x_ref, w1_ref, b1_ref, w2_ref, b2_ref, out_ref, *,
                           inv_m, k_chunk, n_chunks):
    # x: (tb, D), w1: (D, K_pad), b1: (1, K_pad), w2: (K_pad, C_pad),
    # b2: (1, C_pad) where K_pad = padded M*H.
    x = x_ref[...]
    if n_chunks == 1:
        h = jnp.dot(x, w1_ref[...], preferred_element_type=jnp.float32)
        h = jnp.maximum(h + b1_ref[...].astype(jnp.float32), 0.0)
        y = jnp.dot(h.astype(w2_ref.dtype), w2_ref[...],
                    preferred_element_type=jnp.float32)
    else:
        # Chunk the M*H contraction to bound the (tb, M*H) f32 intermediate
        # (vreg/VMEM pressure) while keeping the MXU fed.
        def body(k, acc):
            s = pl.multiple_of(k * k_chunk, k_chunk)
            h = jnp.dot(x, w1_ref[:, pl.ds(s, k_chunk)],
                        preferred_element_type=jnp.float32)
            h = jnp.maximum(h + b1_ref[:, pl.ds(s, k_chunk)].astype(jnp.float32),
                            0.0)
            return acc + jnp.dot(h.astype(w2_ref.dtype),
                                 w2_ref[pl.ds(s, k_chunk), :],
                                 preferred_element_type=jnp.float32)

        y = lax.fori_loop(
            0, n_chunks, body,
            jnp.zeros((x.shape[0], out_ref.shape[1]), jnp.float32),
            unroll=True)

    # 1/M applied in the f32 epilogue; b2 was pre-averaged (not scaled again).
    out_ref[...] = (y * inv_m + b2_ref[...].astype(jnp.float32)).astype(out_ref.dtype)


def prepare_fused_weights(w1, b1, w2, b2, *, k_align=256, lane_pad=128,
                          param_dtype=None):
    """One-time (model-load) prep of the member-fused ensemble weights.

    W1 concatenated along its output dim -> [D, M*H]; W2 stacked along its
    input dim -> [M*H, C]; b2 pre-averaged.  ReLU is elementwise, so
        relu(x @ W1cat + b1cat) @ W2cat * (1/M) + mean(b2)
      == mean_m( relu(x @ W1_m + b1_m) @ W2_m + b2_m )        (exact in f32).
    M*H is zero-padded to a multiple of 256 and C to a multiple of 128;
    padded columns/rows contribute exactly 0.
    """
    M, D, H = w1.shape
    C = w2.shape[-1]
    K = M * H
    K_pad = _round_up(max(K, k_align), k_align)
    C_pad = _round_up(max(C, lane_pad), lane_pad)

    w1_cat = jnp.transpose(w1, (1, 0, 2)).reshape(D, K)
    b1_cat = b1.reshape(1, K)
    w2_cat = w2.reshape(K, C)                                   # NOT pre-scaled
    b2_mean = jnp.mean(b2.astype(jnp.float32), axis=0, keepdims=True)

    w1_cat = jnp.pad(w1_cat, ((0, 0), (0, K_pad - K)))
    b1_cat = jnp.pad(b1_cat, ((0, 0), (0, K_pad - K)))
    w2_cat = jnp.pad(w2_cat, ((0, K_pad - K), (0, C_pad - C)))
    b2_mean = jnp.pad(b2_mean, ((0, 0), (0, C_pad - C)))

    if param_dtype is not None:
        w1_cat = w1_cat.astype(param_dtype)
        w2_cat = w2_cat.astype(param_dtype)

    return dict(w1_cat=w1_cat, b1_cat=b1_cat, w2_cat=w2_cat, b2_mean=b2_mean,
                num_members=M, num_classes=C, param_dtype=param_dtype)


def fused_ensemble_forward(x, fused, *, block_b=512, k_chunk=512):
    w1_cat, b1_cat = fused["w1_cat"], fused["b1_cat"]
    w2_cat, b2_mean = fused["w2_cat"], fused["b2_mean"]
    M = fused["num_members"]
    C = fused["num_classes"]
    D, K_pad = w1_cat.shape
    C_pad = w2_cat.shape[-1]
    B = x.shape[0]

    if fused["param_dtype"] is not None:
        x = x.astype(fused["param_dtype"])

    # Batch tile: multiple of 256 preferred on v6e/v7x (128 fine on v5e);
    # small B just runs one full-batch tile.
    tb = min(block_b, B)

    # Pick an in-kernel K chunk (multiple of 256 dividing K_pad).
    kc = max(256, (min(k_chunk, K_pad) // 256) * 256)
    while K_pad % kc:
        kc -= 256
    n_chunks = K_pad // kc

    x_item = jnp.dtype(x.dtype).itemsize
    w_item = jnp.dtype(w1_cat.dtype).itemsize
    vmem = _vmem_limit(tb * D * x_item, D * K_pad * w_item, K_pad * 4,
                       K_pad * C_pad * w_item, C_pad * 4, tb * C_pad * 4,
                       tb * kc * 4)
    flops = int(2 * B * D * K_pad + 2 * B * K_pad * C_pad)
    bytes_accessed = int(B * D * x_item + D * K_pad * w_item + K_pad * 4
                         + K_pad * C_pad * w_item + C_pad * 4 + B * C_pad * 4)

    kern = functools.partial(_fused_ensemble_kernel, inv_m=1.0 / M,
                             k_chunk=kc, n_chunks=n_chunks)

    out = pl.pallas_call(
        kern,
        out_shape=jax.ShapeDtypeStruct((B, C_pad), jnp.float32),
        grid=(pl.cdiv(B, tb),),
        in_specs=[
            pl.BlockSpec((tb, D), lambda i: (i, 0)),          # x tile (streamed)
            # Grid-invariant weights (resident across batch tiles).
            # TODO(synk): single-buffer via pipeline_mode=pl.Buffered(1) once
            # verified on the target jax/Mosaic version.
            pl.BlockSpec((D, K_pad), lambda i: (0, 0)),       # W1cat
            pl.BlockSpec((1, K_pad), lambda i: (0, 0)),       # b1cat
            pl.BlockSpec((K_pad, C_pad), lambda i: (0, 0)),   # W2cat (un-scaled)
            pl.BlockSpec((1, C_pad), lambda i: (0, 0)),       # mean(b2)
        ],
        out_specs=pl.BlockSpec((tb, C_pad), lambda i: (i, 0)),
        compiler_params=pltpu.CompilerParams(
            # TODO(synk): consider pltpu.CORE_PARALLEL on v7x (2 TCs/chip).
            dimension_semantics=("parallel",),
            vmem_limit_bytes=vmem),
        cost_estimate=pl.CostEstimate(flops=flops, transcendentals=0,
                                      bytes_accessed=bytes_accessed),
    )(x, w1_cat, b1_cat, w2_cat, b2_mean)
    return out[:, :C]


# ----------------------------------------------------------------------------
# Single-member path: member selected via scalar-prefetched index.
# ----------------------------------------------------------------------------
def _member_kernel(mid_ref, x_ref, w1_ref, b1_ref, w2_ref, b2_ref, out_ref):
    # mid_ref: scalar-prefetch SMEM ref (member selection happens in the
    # index_maps); x: (tb, D), w1: (D, H), b1: (1, H), w2: (H, C_pad),
    # b2: (1, C_pad).
    del mid_ref
    h = jnp.dot(x_ref[...], w1_ref[...], preferred_element_type=jnp.float32)
    h = jnp.maximum(h + b1_ref[...].astype(jnp.float32), 0.0)
    y = jnp.dot(h.astype(w2_ref.dtype), w2_ref[...],
                preferred_element_type=jnp.float32)
    out_ref[...] = (y + b2_ref[...].astype(jnp.float32)).astype(out_ref.dtype)


def _member_forward(x, w1, b1, w2, b2, member_id, *, block_b=512,
                    param_dtype=None, lane_pad=128):
    M, D, H = w1.shape
    C = w2.shape[-1]
    B = x.shape[0]
    tb = min(block_b, B)
    C_pad = _round_up(max(C, lane_pad), lane_pad)

    # Lane-dense output: pad the class dim to a multiple of 128 with zeros and
    # slice the result afterwards (avoids masked partial stores).
    w2p = jnp.pad(w2, ((0, 0), (0, 0), (0, C_pad - C)))
    b2p = jnp.pad(b2, ((0, 0), (0, C_pad - C)))

    if param_dtype is not None:
        x = x.astype(param_dtype)
        w1 = w1.astype(param_dtype)
        w2p = w2p.astype(param_dtype)

    # TODO(synk): SWAG posterior .sample() has no posterior stats/checkpoint
    # here; the selected member runs deterministically.
    mid = jnp.asarray(member_id, dtype=jnp.int32).reshape((1,))

    # Tiny biases: slice the selected member's row outside the kernel.
    b1_m = lax.dynamic_slice_in_dim(b1, mid[0], 1, axis=0)    # (1, H)
    b2_m = lax.dynamic_slice_in_dim(b2p, mid[0], 1, axis=0)   # (1, C_pad)

    x_item = jnp.dtype(x.dtype).itemsize
    w_item = jnp.dtype(w1.dtype).itemsize
    vmem = _vmem_limit(tb * D * x_item, D * H * w_item, H * 4,
                       H * C_pad * w_item, C_pad * 4, tb * C_pad * 4)

    out = pl.pallas_call(
        _member_kernel,
        out_shape=jax.ShapeDtypeStruct((B, C_pad), jnp.float32),
        grid_spec=pltpu.PrefetchScalarGridSpec(
            num_scalar_prefetch=1,
            grid=(pl.cdiv(B, tb),),
            in_specs=[
                pl.BlockSpec((tb, D), lambda i, m: (i, 0)),               # x
                pl.BlockSpec((None, D, H), lambda i, m: (m[0], 0, 0)),    # W1[mid]
                pl.BlockSpec((1, H), lambda i, m: (0, 0)),                # b1[mid]
                pl.BlockSpec((None, H, C_pad), lambda i, m: (m[0], 0, 0)),  # W2[mid]
                pl.BlockSpec((1, C_pad), lambda i, m: (0, 0)),            # b2[mid]
            ],
            out_specs=pl.BlockSpec((tb, C_pad), lambda i, m: (i, 0)),
        ),
        compiler_params=pltpu.CompilerParams(
            dimension_semantics=("parallel",), vmem_limit_bytes=vmem),
    )(mid, x, w1, b1_m, w2p, b2_m)
    return out[:, :C]


# ----------------------------------------------------------------------------
# Public forward matching the PyTorch Model.forward semantics.
# ----------------------------------------------------------------------------
def multi_swag_forward(x, w1, b1, w2, b2, member_id=None, *, fused=None,
                       block_b=512, param_dtype=None):
    """member_id=None -> ensemble mean; member_id given -> that member.

    `fused` is an optional cached result of prepare_fused_weights() (compute it
    once at model-load time to avoid per-call HBM relayout of the weights).
    """
    if member_id is not None:
        return _member_forward(x, w1, b1, w2, b2, member_id,
                               block_b=block_b, param_dtype=param_dtype)
    if fused is None:
        fused = prepare_fused_weights(w1, b1, w2, b2, param_dtype=param_dtype)
    return fused_ensemble_forward(x, fused, block_b=block_b)


# ----------------------------------------------------------------------------
# Pure-JAX reference
# ----------------------------------------------------------------------------
def _reference(x, w1, b1, w2, b2):
    outs = []
    for m in range(w1.shape[0]):
        h = jnp.maximum(x @ w1[m] + b1[m], 0.0)
        outs.append(h @ w2[m] + b2[m])
    return jnp.stack(outs).mean(0)


if __name__ == "__main__":
    # Small, deterministic synthetic setup.
    B, D, H, C, M = 8, 32, 64, 16, 3

    key = jax.random.PRNGKey(0)
    kx, kw1, kb1, kw2, kb2 = jax.random.split(key, 5)

    x = jax.random.normal(kx, (B, D), dtype=jnp.float32)
    w1 = jax.random.normal(kw1, (M, D, H), dtype=jnp.float32) * 0.1
    b1 = jax.random.normal(kb1, (M, H), dtype=jnp.float32) * 0.1
    w2 = jax.random.normal(kw2, (M, H, C), dtype=jnp.float32) * 0.1
    b2 = jax.random.normal(kb2, (M, C), dtype=jnp.float32) * 0.1

    # One-time weight prep (model-load time), reused across forward calls.
    fused = prepare_fused_weights(w1, b1, w2, b2)

    # Ensemble-mean path (member_id=None): single fused kernel.
    pred = jax.block_until_ready(
        multi_swag_forward(x, w1, b1, w2, b2, fused=fused))
    ref = _reference(x, w1, b1, w2, b2)
    assert pred.shape == (B, C)
    assert jnp.allclose(pred, ref, atol=1e-5, rtol=1e-5), "ensemble mismatch"

    # Single-member path (member_id given): scalar-prefetch member select.
    pred1 = jax.block_until_ready(
        multi_swag_forward(x, w1, b1, w2, b2, member_id=1))
    ref1 = jnp.maximum(x @ w1[1] + b1[1], 0.0) @ w2[1] + b2[1]
    assert pred1.shape == (B, C)
    assert jnp.allclose(pred1, ref1, atol=1e-5, rtol=1e-5), "member mismatch"

    print("KERNEL_OK")
</pallas_src>

<mosaic_0001>
module attributes {stable_mosaic.version = 11 : i64} {
  func.func @_fused_ensemble_kernel(%arg0: i32, %arg1: memref<8x32xf32, #tpu.memory_space<vmem>>, %arg2: memref<32x256xf32, #tpu.memory_space<vmem>>, %arg3: memref<1x256xf32, #tpu.memory_space<vmem>>, %arg4: memref<256x128xf32, #tpu.memory_space<vmem>>, %arg5: memref<1x128xf32, #tpu.memory_space<vmem>>, %arg6: memref<8x128xf32, #tpu.memory_space<vmem>>) attributes {dimension_semantics = [#tpu.dimension_semantics<parallel>], iteration_bounds = array<i64: 1>, scalar_prefetch = 0 : i64, scratch_operands = 0 : i64, tpu.core_type = #tpu.core_type<tc>, window_params = [{transform_indices = @transform_0, window_bounds = array<i64: 8, 32>}, {pipeline_mode = #tpu.pipeline_mode<synchronous>, transform_indices = @transform_1, window_bounds = array<i64: 32, 256>}, {pipeline_mode = #tpu.pipeline_mode<synchronous>, transform_indices = @transform_2, window_bounds = array<i64: 1, 256>}, {pipeline_mode = #tpu.pipeline_mode<synchronous>, transform_indices = @transform_3, window_bounds = array<i64: 256, 128>}, {pipeline_mode = #tpu.pipeline_mode<synchronous>, transform_indices = @transform_4, window_bounds = array<i64: 1, 128>}, {transform_indices = @transform_5, window_bounds = array<i64: 8, 128>}]} {
    %c0 = arith.constant 0 : index
    %c0_0 = arith.constant 0 : index
    %0 = vector.load %arg1[%c0, %c0_0] : memref<8x32xf32, #tpu.memory_space<vmem>>, vector<8x32xf32>
    %c0_1 = arith.constant 0 : index
    %c0_2 = arith.constant 0 : index
    %1 = vector.load %arg2[%c0_1, %c0_2] : memref<32x256xf32, #tpu.memory_space<vmem>>, vector<32x256xf32>
    %cst = arith.constant dense<0.000000e+00> : vector<8x256xf32>
    %2 = tpu.matmul %0, %1, %cst {dimension_numbers = #tpu.dot_dimension_numbers<[1], [0], [0], [1], [0, 0, 1, 1], [], []>} : vector<8x32xf32>, vector<32x256xf32>, vector<8x256xf32> -> vector<8x256xf32>
    %c0_3 = arith.constant 0 : index
    %c0_4 = arith.constant 0 : index
    %3 = vector.load %arg3[%c0_3, %c0_4] : memref<1x256xf32, #tpu.memory_space<vmem>>, vector<1x256xf32>
    %4 = vector.broadcast %3 : vector<1x256xf32> to vector<8x256xf32>
    %5 = arith.addf %2, %4 : vector<8x256xf32>
    %cst_5 = arith.constant 0.000000e+00 : f32
    %6 = vector.broadcast %cst_5 : f32 to vector<8x256xf32>
    %7 = arith.maximumf %5, %6 : vector<8x256xf32>
    %c0_6 = arith.constant 0 : index
    %c0_7 = arith.constant 0 : index
    %8 = vector.load %arg4[%c0_6, %c0_7] : memref<256x128xf32, #tpu.memory_space<vmem>>, vector<256x128xf32>
    %cst_8 = arith.constant dense<0.000000e+00> : vector<8x128xf32>
    %9 = tpu.matmul %7, %8, %cst_8 {dimension_numbers = #tpu.dot_dimension_numbers<[1], [0], [0], [1], [0, 0, 1, 1], [], []>} : vector<8x256xf32>, vector<256x128xf32>, vector<8x128xf32> -> vector<8x128xf32>
    %cst_9 = arith.constant 0.333333343 : f32
    %10 = vector.broadcast %cst_9 : f32 to vector<8x128xf32>
    %11 = arith.mulf %9, %10 : vector<8x128xf32>
    %c0_10 = arith.constant 0 : index
    %c0_11 = arith.constant 0 : index
    %12 = vector.load %arg5[%c0_10, %c0_11] : memref<1x128xf32, #tpu.memory_space<vmem>>, vector<1x128xf32>
    %13 = vector.broadcast %12 : vector<1x128xf32> to vector<8x128xf32>
    %14 = arith.addf %11, %13 : vector<8x128xf32>
    %c0_12 = arith.constant 0 : index
    %c0_13 = arith.constant 0 : index
    %15 = vector.load %arg6[%c0_12, %c0_13] : memref<8x128xf32, #tpu.memory_space<vmem>>, vector<8x128xf32>
    tpu.vector_store %arg6[%c0_12, %c0_13], %14 {strides = array<i32>} : memref<8x128xf32, #tpu.memory_space<vmem>>, vector<8x128xf32>,
    return
  }
  func.func @transform_0(%arg0: i32) -> (i32, i32) {
    %c0_i32 = arith.constant 0 : i32
    %c0_i32_0 = arith.constant 0 : i32
    return %arg0, %c0_i32 : i32, i32
  }
  func.func @transform_1(%arg0: i32) -> (i32, i32) {
    %c0_i32 = arith.constant 0 : i32
    %c0_i32_0 = arith.constant 0 : i32
    %c0_i32_1 = arith.constant 0 : i32
    return %c0_i32, %c0_i32_0 : i32, i32
  }
  func.func @transform_2(%arg0: i32) -> (i32, i32) {
    %c0_i32 = arith.constant 0 : i32
    %c0_i32_0 = arith.constant 0 : i32
    %c0_i32_1 = arith.constant 0 : i32
    return %c0_i32, %c0_i32_0 : i32, i32
  }
  func.func @transform_3(%arg0: i32) -> (i32, i32) {
    %c0_i32 = arith.constant 0 : i32
    %c0_i32_0 = arith.constant 0 : i32
    %c0_i32_1 = arith.constant 0 : i32
    return %c0_i32, %c0_i32_0 : i32, i32
  }
  func.func @transform_4(%arg0: i32) -> (i32, i32) {
    %c0_i32 = arith.constant 0 : i32
    %c0_i32_0 = arith.constant 0 : i32
    %c0_i32_1 = arith.constant 0 : i32
    return %c0_i32, %c0_i32_0 : i32, i32
  }
  func.func @transform_5(%arg0: i32) -> (i32, i32) {
    %c0_i32 = arith.constant 0 : i32
    %c0_i32_0 = arith.constant 0 : i32
    return %arg0, %c0_i32 : i32, i32
  }
}

</mosaic_0001>

<bundles_post_ra>
// kernel: tpu_custom_call.1
= control target key start
LH: loop header
LB: loop body
LE: loop exit
PB: predicated region body
PF: predicated region fallthrough
CT: control target
= control target key end

     0   :  { %10 = vsyncpa [#allocation3], 0  ;;  %s475_s0 = inlined_call_operand.hbm [shape: f32[8,32], index: 0, kind: input, shape index: {}]   ;;  %s476_s1 = inlined_call_operand.hbm [shape: f32[32,256], index: 1, kind: input, shape index: {}]   ;;  %s477_s2 = inlined_call_operand.vmem [shape: f32[1,256], index: 2, kind: input, shape index: {}]   ;;  %s478_s3 = inlined_call_operand.hbm [shape: f32[256,128], index: 3, kind: input, shape index: {}]   ;;  %s479_s4 = inlined_call_operand.vmem [shape: f32[1,128], index: 4, kind: input, shape index: {}]   ;;  %s480_s5 = inlined_call_operand.hbm [shape: f32[8,128], index: 5, kind: output, shape index: {}]  }
   0x1   :  { %11 = vsyncpa [#allocation6], 0 }
   0x2   :  { %12 = vsyncpa [#allocation4], 0  ;;  %s418_s18 = smov [#allocation5]  }
   0x3   :  { %s28_s19 = sshll.u32 %s418_s18, 4  ;;  %s29_s19 = int_to_ptr.vmem [resolvable:$true] %s28_s19 }
   0x4   :  { %s340_s20 = scalar_lea.vmem %s29_s19, 1024  ;;  %p345_p1 = scmp.lt.s32.totalorder %s29_s19, %s29_s19 }
   0x5   :  { %p341_p0 = scmp.ne.s32.totalorder %s29_s19, %s340_s20  ;;  %p346_p2 = scmp.lt.s32.totalorder %s340_s20, %s340_s20 }
   0x7   :  { %p347_p3 = por %p346_p2, %p345_p1 }
   0x9   :  { %p348_p4 = pnand %p347_p3, %p341_p0 }
   0xb   :  { %351 = shalt.err (!%p348_p4)
}
   0xc   :  { %s419_s21 = smov 256   ;;  %s420_s22 = smov 16  }
   0xd   :  { %34 = dma.hbm_to_vmem [thread:$0]  %s476_s1, 1024, %s29_s19, [#allocation6], %s419_s21, %s419_s21, %s420_s22  }
   0xe   :  { %s421_s25 = smov [#allocation2]   ;;  %s422_s27 = smov [#allocation7]  }
   0xf   :  { %s19_s26 = sshll.u32 %s421_s25, 4  ;;  %s42_s28 = sshll.u32 %s422_s27, 4  ;;  %s20_s26 = int_to_ptr.vmem [resolvable:$true] %s19_s26  ;;  %s43_s28 = int_to_ptr.vmem [resolvable:$true] %s42_s28 }
  0x10   :  { %s360_s29 = scalar_lea.vmem %s20_s26, 128  ;;  %p365_p6 = scmp.lt.s32.totalorder %s20_s26, %s20_s26 }
  0x11   :  { %p361_p5 = scmp.ne.s32.totalorder %s20_s26, %s360_s29  ;;  %p366_p7 = scmp.lt.s32.totalorder %s360_s29, %s360_s29 }
  0x13   :  { %p367_p8 = por %p366_p7, %p365_p6 }
  0x15   :  { %p368_p9 = pnand %p367_p8, %p361_p5 }
  0x17   :  { %371 = shalt.err (!%p368_p9)
}
  0x18   :  { %22 = dma.hbm_to_vmem [thread:$0]  %s475_s0, 128, %s20_s26, [#allocation3]  }
  0x19   :  { %s380_s7 = scalar_lea.vmem %s43_s28, 4096  ;;  %p385_p11 = scmp.lt.s32.totalorder %s43_s28, %s43_s28 }
  0x1a   :  { %p381_p10 = scmp.ne.s32.totalorder %s43_s28, %s380_s7  ;;  %p386_p12 = scmp.lt.s32.totalorder %s380_s7, %s380_s7 }
  0x1c   :  { %p387_p13 = por %p386_p12, %p385_p11 }
  0x1e   :  { %p388_p0 = pnand %p387_p13, %p381_p10 }
  0x20   :  { %391 = shalt.err (!%p388_p0)
}
  0x21   :  { %s423_s1 = smov 128   ;;  %s424_s8 = smov 8  }
  0x22   :  { %48 = dma.hbm_to_vmem [thread:$0]  %s478_s3, 4096, %s43_s28, [#allocation6], %s423_s1, %s423_s1, %s424_s8  }
  0x23   :  { %412 = dma.done.wait [#allocation3], 128  }
  0x24   :  { %413 = vsyncadd [#allocation3], 4294967168 }
  0x25   :  { %414 = dma.done.wait [#allocation6], 5120  }
  0x26   :  { %415 = vsyncadd [#allocation6], 4294962176  ;;  %v425_v0 = vmov 0.0   ;;  %v68_v1 = vld [vmem:[#allocation5 + $0x38] sm:$0xff]  ;;  %v67_v2 = vld [vmem:[#allocation5 + $0x30] sm:$0xff]  ;;  %vm81_vm0 = vcmask 261120   ;;  %v71_v42 = vlaneseq }
  0x27   :  { %149 = vmatprep.mubr.f32.mxu0 %v425_v0  ;;  %v66_v3 = vld [vmem:[#allocation5 + $0x28] sm:$0xff]  ;;  %109 = vmatprep.subr.mxu0 %v68_v1  ;;  %v65_v4 = vld [vmem:[#allocation5 + $0x20] sm:$0xff]  ;;  %v64_v5 = vld [vmem:[#allocation5 + $0x18] sm:$0xff]  ;;  %s426_s13 = smov [#allocation8]  }
  0x28   :  { %110 = vmatpush1.msra.mxu0 %v67_v2  ;;  %v63_v6 = vld [vmem:[#allocation5 + $0x10] sm:$0xff]  ;;  %v189_v7 = vld [vmem:[#allocation7 + $0xf8] sm:$0xff]  ;;  %v62_v10 = vld [vmem:[#allocation5 + $0x8] sm:$0xff]  ;;  %v72_v43 = vshrl.u32 %v71_v42, 7 }
  0x29   :  { %111 = vmatprep.subr.mxu0 %v66_v3  ;;  %v173_v8 = vld [vmem:[#allocation7 + $0x78] sm:$0xff]  ;;  %v188_v9 = vld [vmem:[#allocation7 + $0xf0] sm:$0xff]  ;;  %288 = vmatprep.subr.mxu1 %v189_v7  ;;  %v61_v12 = vld [vmem:[#allocation5] sm:$0xff] }
  0x2a   :  { %112 = vmatpush1.msra.mxu0 %v65_v4  ;;  %v172_v11 = vld [vmem:[#allocation7 + $0x70] sm:$0xff]  ;;  %289 = vmatpush3.msra.mxu1 %v173_v8  ;;  %v187_v13 = vld [vmem:[#allocation7 + $0xe8] sm:$0xff]  ;;  %v60_v14 = vld [vmem:[#allocation2] sm:$0xff]  ;;  %v73_v44 = vsub.s32 0, %v72_v43  ;;  %v77_v46 = vsub.s32 1, %v72_v43 }
  0x2b   :  { %113 = vmatprep.subr.mxu0 %v64_v5  ;;  %290 = vmatprep.subr.mxu1 %v188_v9  ;;  %v171_v15 = vld [vmem:[#allocation7 + $0x68] sm:$0xff]  ;;  %v186_v16 = vld [vmem:[#allocation7 + $0xe0] sm:$0xff]  ;;  %v185_v18 = vld [vmem:[#allocation7 + $0xd8] sm:$0xff] }
  0x2c   :  { %114 = vmatpush1.msra.mxu0 %v63_v6  ;;  %291 = vmatpush3.msra.mxu1 %v172_v11  ;;  %v170_v17 = vld [vmem:[#allocation7 + $0x60] sm:$0xff]  ;;  %v169_v19 = vld [vmem:[#allocation7 + $0x58] sm:$0xff]  ;;  %v184_v20 = vld [vmem:[#allocation7 + $0xd0] sm:$0xff] }
  0x2d   :  { %115 = vmatprep.subr.mxu0 %v62_v10  ;;  %292 = vmatprep.subr.mxu1 %v187_v13  ;;  %v168_v21 = vld [vmem:[#allocation7 + $0x50] sm:$0xff]  ;;  %v183_v22 = vld [vmem:[#allocation7 + $0xc8] sm:$0xff]  ;;  %v182_v24 = vld [vmem:[#allocation7 + $0xc0] sm:$0xff] }
  0x2e   :  { %116 = vmatpush1.msra.mxu0 %v61_v12  ;;  %293 = vmatpush3.msra.mxu1 %v171_v15  ;;  %v167_v23 = vld [vmem:[#allocation7 + $0x48] sm:$0xff]  ;;  %v166_v25 = vld [vmem:[#allocation7 + $0x40] sm:$0xff]  ;;  %v181_v26 = vld [vmem:[#allocation7 + $0xb8] sm:$0xff] }
  0x2f   :  { %286 = vmatmul.mubr.msk.f32.vlgmr.msra.gmra.mxu0 %vm81_vm0, %v60_v14  ;;  %294 = vmatprep.subr.mxu1 %v186_v16  ;;  %v165_v27 = vld [vmem:[#allocation7 + $0x38] sm:$0xff]  ;;  %v180_v28 = vld [vmem:[#allocation7 + $0xb0] sm:$0xff]  ;;  %v179_v30 = vld [vmem:[#allocation7 + $0xa8] sm:$0xff] }
  0x30   :  { %295 = vmatpush3.msra.mxu1 %v170_v17  ;;  %v164_v29 = vld [vmem:[#allocation7 + $0x30] sm:$0xff]  ;;  %v163_v31 = vld [vmem:[#allocation7 + $0x28] sm:$0xff]  ;;  %v178_v32 = vld [vmem:[#allocation7 + $0xa0] sm:$0xff] }
  0x31   :  { %296 = vmatprep.subr.mxu1 %v185_v18  ;;  %v162_v33 = vld [vmem:[#allocation7 + $0x20] sm:$0xff]  ;;  %v177_v34 = vld [vmem:[#allocation7 + $0x98] sm:$0xff]  ;;  %v176_v36 = vld [vmem:[#allocation7 + $0x90] sm:$0xff] }
  0x32   :  { %297 = vmatpush3.msra.mxu1 %v169_v19  ;;  %v161_v35 = vld [vmem:[#allocation7 + $0x18] sm:$0xff]  ;;  %v160_v37 = vld [vmem:[#allocation7 + $0x10] sm:$0xff]  ;;  %v175_v38 = vld [vmem:[#allocation7 + $0x88] sm:$0xff] }
  0x33   :  { %298 = vmatprep.subr.mxu1 %v184_v20  ;;  %v159_v39 = vld [vmem:[#allocation7 + $0x8] sm:$0xff]  ;;  %v174_v40 = vld [vmem:[#allocation7 + $0x80] sm:$0xff]  ;;  %v69_v45 = vld [vmem:[%s477_s2] sm:$0x3]  ;;  %s276_s2 = sshll.u32 %s426_s13, 4  ;;  %s277_s2 = int_to_ptr.vmem [resolvable:$true] %s276_s2 }
  0x34   :  { %299 = vmatpush3.msra.mxu1 %v168_v21  ;;  %v158_v41 = vld [vmem:[#allocation7] sm:$0xff]  ;;  %v74_v47 = vrot.slane %v69_v45, %v73_v44  ;;  %v78_v48 = vrot.slane %v69_v45, %v77_v46  ;;  %v287_v58 = vld [vmem:[%s479_s4] ss:$0 sm:$0xff]  ;;  %s392_s14 = scalar_lea.vmem %s277_s2, 128  ;;  %p397_p2 = scmp.lt.s32.totalorder %s277_s2, %s277_s2 }
  0x35   :  { %300 = vmatprep.subr.mxu1 %v183_v22  ;;  %p393_p1 = scmp.ne.s32.totalorder %s277_s2, %s392_s14  ;;  %p398_p3 = scmp.lt.s32.totalorder %s392_s14, %s392_s14 }
  0x36   :  { %301 = vmatpush3.msra.mxu1 %v167_v23 }
  0x37   :  { %302 = vmatprep.subr.mxu1 %v182_v24  ;;  %p399_p4 = por %p398_p3, %p397_p2 }
  0x38   :  { %303 = vmatpush3.msra.mxu1 %v166_v25 }
  0x39   :  { %304 = vmatprep.subr.mxu1 %v181_v26  ;;  %p400_p5 = pnand %p399_p4, %p393_p1 }
  0x3a   :  { %305 = vmatpush3.msra.mxu1 %v165_v27 }
  0x3b   :  { %306 = vmatprep.subr.mxu1 %v180_v28 }
  0x3c   :  { %307 = vmatpush3.msra.mxu1 %v164_v29 }
  0x3d   :  { %308 = vmatprep.subr.mxu1 %v179_v30 }
  0x3e   :  { %309 = vmatpush3.msra.mxu1 %v163_v31 }
  0x3f   :  { %310 = vmatprep.subr.mxu1 %v178_v32 }
  0x40   :  { %311 = vmatpush3.msra.mxu1 %v162_v33 }
  0x41   :  { %312 = vmatprep.subr.mxu1 %v177_v34 }
  0x42   :  { %313 = vmatpush3.msra.mxu1 %v161_v35 }
  0x43   :  { %314 = vmatprep.subr.mxu1 %v176_v36 }
  0x44   :  { %315 = vmatpush3.msra.mxu1 %v160_v37 }
  0x45   :  { %316 = vmatprep.subr.mxu1 %v175_v38 }
  0x46   :  { %317 = vmatpush3.msra.mxu1 %v159_v39 }
  0x47   :  { %318 = vmatprep.subr.mxu1 %v174_v40 }
  0x48   :  { %319 = vmatpush3.msra.mxu1 %v158_v41 }
  0xef   :  { %v151_v49 = vpop.f32.mrf.mxu0 }
  0xf0   :  { %v152_v50 = vadd.f32 %v151_v49, %v74_v47 }
  0xf1   :  { %v153_v51 = vpop.f32.mrf.mxu0 }
  0xf2   :  { %v154_v52 = vadd.f32 %v153_v51, %v78_v48  ;;  %v156_v54 = vmax.f32 %v152_v50, 0.0 }
  0xf4   :  { %v157_v53 = vmax.f32 %v154_v52, 0.0 }
  0xf6   :  { %254 = vmatprep.mubr.f32.mxu1 %v157_v53 }
  0xf7   :  { %255 = vmatmul.mubr.f32.vlgmr.msra.gmra.mxu1 %v156_v54 }
 0x1b7   :  { %v320_v55 = vpop.f32.mrf.mxu1 }
 0x1b9   :  { %v321_v56 = vpop.f32.mrf.mxu1 }
 0x1ba   :  { %v322_v57 = vadd.f32 %v321_v56, %v320_v55 }
 0x1bc   :  { %v260_v59 = vmul.f32 0.33333334, %v322_v57 }
 0x1be   :  { %v268_v60 = vadd.f32 %v287_v58, %v260_v59 }
 0x1c0   :  { %269 = vst [vmem:[#allocation8] sm:$0xff] %v268_v60 }
 0x1c1   :  { %403 = shalt.err (!%p400_p5)
}
 0x1c2   :  { %279 = dma.vmem_to_hbm [thread:$0]  %s277_s2, 128, %s480_s5, [#allocation4]  }
 0x1c3   :  { %416 = dma.done.wait [#allocation4], 128  }
 0x1c4   :  { %417 = vsyncadd [#allocation4], 4294967168 }
 0x1c5   :  { %283 = vsyncpa [#allocation3], 1 }
 0x1c6   :  { %284 = vsyncpa [#allocation6], 1 }
 0x1c7   :  { %285 = vsyncpa [#allocation4], 1 }

</bundles_post_ra>
